<compile_context>
chip_gen: v5e
topology: v5e:2x2
jax: 0.10.0
libtpu: 0.0.40
codegen_flags: <defaults>
</compile_context>

<pallas_src>
import functools

import jax
import jax.numpy as jnp
from jax.experimental import pallas as pl
from jax.experimental.pallas import tpu as pltpu

HIDDEN = 128  # hidden width fixed by the module
NEG_SLOPE = 0.01


def _mlp_kernel(x_ref, w1_ref, b1_ref, w2_ref, b2_ref, w3_ref, b3_ref,
                w4_ref, b4_ref, w5_ref, b5_ref, o_ref, h_ref, *,
                negative_slope):
    """Grid = (M tiles, N tiles of the output).  Layers 1-4 run once per
    M tile (at N tile 0); their result lives in h_ref (f32 VMEM scratch).
    Every grid step computes only the final layer's N tile."""

    def lrelu(y):
        return jnp.where(y > 0, y, negative_slope * y)

    def layer(a, w_ref, b_ref):
        # Cast the activation to the (possibly bf16) weight dtype so the MXU
        # sees matched operands; always accumulate in f32.
        y = jnp.dot(a.astype(w_ref.dtype), w_ref[...],
                    preferred_element_type=jnp.float32)
        return y + b_ref[...]

    @pl.when(pl.program_id(1) == 0)
    def _():
        h = lrelu(layer(x_ref[...], w1_ref, b1_ref))
        h = lrelu(layer(h, w2_ref, b2_ref))
        h = lrelu(layer(h, w3_ref, b3_ref))
        h = lrelu(layer(h, w4_ref, b4_ref))
        h_ref[...] = h

    o_ref[...] = layer(h_ref[...], w5_ref, b5_ref).astype(o_ref.dtype)


def _pick_n_tile(dim, cap=4096):
    """Lane-dense output tile: full dim if it fits, else the largest multiple
    of 128 <= cap that divides dim, else cap (edge block masked via cdiv)."""
    if dim <= cap:
        return dim
    best = None
    t = 128
    while t <= cap:
        if dim % t == 0:
            best = t
        t += 128
    return best if best is not None else cap


def _pick_m_tile(m, cap=256):
    if m <= cap:
        return m
    t = cap
    while t >= 8:
        if m % t == 0:
            return t
        t -= 8
    return cap  # non-dividing; edge block masked via cdiv


def _vmem_limit_bytes(d_in, tm, tn, w_bytes):
    """Residency estimate (2 buffers per BlockSpec) + headroom, capped at
    ~75% of physical VMEM (generation-aware)."""
    f32 = 4
    est = 0
    est += 2 * tm * d_in * f32                 # x M-tile
    est += 2 * d_in * HIDDEN * w_bytes         # w1 (resident)
    est += 2 * 3 * HIDDEN * HIDDEN * w_bytes   # w2..w4 (resident)
    est += 2 * 4 * HIDDEN * f32                # b1..b4
    est += 2 * HIDDEN * tn * w_bytes           # w5 N-tile
    est += 2 * tn * f32                        # b5 N-tile
    est += 2 * tm * tn * f32                   # output tile
    est += tm * HIDDEN * f32                   # h scratch
    est = int(est * 1.25) + (4 << 20)          # compiler scratch headroom

    cap = 48 << 20                             # safe even on v7x (64 MiB phys)
    try:
        info = pltpu.get_tpu_info()
        phys = getattr(info, "vmem_capacity_bytes", None)
        if phys:
            cap = int(phys) * 3 // 4
    except Exception:
        pass
    return max(min(est, cap), 16 << 20)


def mlp_pallas(xf, params, *, negative_slope=NEG_SLOPE, weights_dtype=None):
    """xf: (M, latent) f32.  params: 5 tuples of (W (in,out), b (1,out)) f32.
    weights_dtype=jnp.bfloat16 streams the weights in bf16 (biases stay f32)."""
    (w1, b1), (w2, b2), (w3, b3), (w4, b4), (w5, b5) = params
    M, d_in = xf.shape
    assert w1.shape == (d_in, HIDDEN)
    d_out = w5.shape[1]

    if weights_dtype is not None:
        # Ideally weights would already live in HBM at this dtype; casting
        # here keeps the demo self-contained.
        w1, w2, w3, w4, w5 = (w.astype(weights_dtype)
                              for w in (w1, w2, w3, w4, w5))
    w_bytes = jnp.dtype(w1.dtype).itemsize

    tm = _pick_m_tile(M)
    tn = _pick_n_tile(d_out)
    grid = (pl.cdiv(M, tm), pl.cdiv(d_out, tn))

    resident = lambda i, j: (0, 0)   # constant block index -> stays in VMEM
    kernel = functools.partial(_mlp_kernel, negative_slope=negative_slope)

    return pl.pallas_call(
        kernel,
        out_shape=jax.ShapeDtypeStruct((M, d_out), xf.dtype),
        grid_spec=pltpu.PrefetchScalarGridSpec(
            num_scalar_prefetch=0,
            grid=grid,
            in_specs=[
                pl.BlockSpec((tm, d_in), lambda i, j: (i, 0)),     # x M-tile
                pl.BlockSpec((d_in, HIDDEN), resident),            # w1
                pl.BlockSpec((1, HIDDEN), resident),               # b1
                pl.BlockSpec((HIDDEN, HIDDEN), resident),          # w2
                pl.BlockSpec((1, HIDDEN), resident),               # b2
                pl.BlockSpec((HIDDEN, HIDDEN), resident),          # w3
                pl.BlockSpec((1, HIDDEN), resident),               # b3
                pl.BlockSpec((HIDDEN, HIDDEN), resident),          # w4
                pl.BlockSpec((1, HIDDEN), resident),               # b4
                pl.BlockSpec((HIDDEN, tn), lambda i, j: (0, j)),   # w5 N-tile
                pl.BlockSpec((1, tn), lambda i, j: (0, j)),        # b5 N-tile
            ],
            out_specs=pl.BlockSpec((tm, tn), lambda i, j: (i, j)),
            scratch_shapes=[pltpu.VMEM((tm, HIDDEN), jnp.float32)],  # h
        ),
        compiler_params=pltpu.CompilerParams(
            # M axis parallel (megacore); N axis must be 'arbitrary' so the
            # pl.when(j == 0) hoist sees j == 0 on every core / M-tile.
            dimension_semantics=("parallel", "arbitrary"),
            vmem_limit_bytes=_vmem_limit_bytes(d_in, tm, tn, w_bytes),
        ),
    )(xf, w1, b1, w2, b2, w3, b3, w4, b4, w5, b5)


def init_mlp_params(key, latent_dim, hidden=HIDDEN):
    """Deterministic init matching nn.Linear default U(-1/sqrt(fan_in), ...).
    Weights stored as (in, out); biases as (1, out)."""
    dims = [(latent_dim, hidden), (hidden, hidden), (hidden, hidden),
            (hidden, hidden), (hidden, latent_dim)]
    params = []
    for i, (fan_in, fan_out) in enumerate(dims):
        kw, kb = jax.random.split(jax.random.fold_in(key, i))
        bound = 1.0 / (fan_in ** 0.5)
        w = jax.random.uniform(kw, (fan_in, fan_out), jnp.float32, -bound, bound)
        b = jax.random.uniform(kb, (1, fan_out), jnp.float32, -bound, bound)
        params.append((w, b))
    return params


@functools.partial(jax.jit, static_argnames=("weights_dtype",))
def mlp_forward(x, params, weights_dtype=None):
    """x: (bs, c, h, w) -> (bs, 4, h, w), matching FiveLayerMLP.forward."""
    bs, c, h, w = x.shape
    xf = x.reshape(bs, c * h * w)
    out = mlp_pallas(xf, params, weights_dtype=weights_dtype)
    return out.reshape(bs, 4, h, w)


if __name__ == "__main__":
    key = jax.random.PRNGKey(0)
    kx, kp = jax.random.split(key)

    # Small shapes consistent with the module: latent_dim = c*h*w = 4*16*16.
    bs, c, h, w = 2, 4, 16, 16
    latent = c * h * w
    x = jax.random.normal(kx, (bs, c, h, w), jnp.float32)
    params = init_mlp_params(kp, latent)

    # f32 path (bit-for-bit vs. the fp32 reference).
    out = mlp_forward(x, params)
    jax.block_until_ready(out)

    # Plain-JAX reference of FiveLayerMLP.forward.
    ref = x.reshape(bs, latent)
    for i, (wgt, bias) in enumerate(params):
        ref = ref @ wgt + bias[0]
        if i < 4:
            ref = jnp.where(ref > 0, ref, NEG_SLOPE * ref)
    ref = ref.reshape(bs, 4, h, w)

    assert out.shape == (bs, 4, h, w)
    assert jnp.allclose(out, ref, atol=1e-4, rtol=1e-4)

    # bf16 weight-streaming path (perf mode); looser aggregate tolerance.
    out_bf16 = mlp_forward(x, params, weights_dtype=jnp.bfloat16)
    jax.block_until_ready(out_bf16)
    rel_err = jnp.linalg.norm(out_bf16 - ref) / jnp.linalg.norm(ref)
    assert float(rel_err) < 0.05

    print("KERNEL_OK")
</pallas_src>

<mosaic_0001>
module attributes {stable_mosaic.version = 11 : i64} {
  func.func @_mlp_kernel(%arg0: i32, %arg1: i32, %arg2: memref<2x1024xf32, #tpu.memory_space<vmem>>, %arg3: memref<1024x128xf32, #tpu.memory_space<vmem>>, %arg4: memref<1x128xf32, #tpu.memory_space<vmem>>, %arg5: memref<128x128xf32, #tpu.memory_space<vmem>>, %arg6: memref<1x128xf32, #tpu.memory_space<vmem>>, %arg7: memref<128x128xf32, #tpu.memory_space<vmem>>, %arg8: memref<1x128xf32, #tpu.memory_space<vmem>>, %arg9: memref<128x128xf32, #tpu.memory_space<vmem>>, %arg10: memref<1x128xf32, #tpu.memory_space<vmem>>, %arg11: memref<128x1024xf32, #tpu.memory_space<vmem>>, %arg12: memref<1x1024xf32, #tpu.memory_space<vmem>>, %arg13: memref<2x1024xf32, #tpu.memory_space<vmem>>, %arg14: memref<2x128xf32, #tpu.memory_space<vmem>>) attributes {dimension_semantics = [#tpu.dimension_semantics<parallel>, #tpu.dimension_semantics<arbitrary>], iteration_bounds = array<i64: 1, 1>, scalar_prefetch = 0 : i64, scratch_operands = 1 : i64, tpu.core_type = #tpu.core_type<tc>, window_params = [{transform_indices = @transform_0, window_bounds = array<i64: 2, 1024>}, {pipeline_mode = #tpu.pipeline_mode<synchronous>, transform_indices = @transform_1, window_bounds = array<i64: 1024, 128>}, {pipeline_mode = #tpu.pipeline_mode<synchronous>, transform_indices = @transform_2, window_bounds = array<i64: 1, 128>}, {pipeline_mode = #tpu.pipeline_mode<synchronous>, transform_indices = @transform_3, window_bounds = array<i64: 128, 128>}, {pipeline_mode = #tpu.pipeline_mode<synchronous>, transform_indices = @transform_4, window_bounds = array<i64: 1, 128>}, {pipeline_mode = #tpu.pipeline_mode<synchronous>, transform_indices = @transform_5, window_bounds = array<i64: 128, 128>}, {pipeline_mode = #tpu.pipeline_mode<synchronous>, transform_indices = @transform_6, window_bounds = array<i64: 1, 128>}, {pipeline_mode = #tpu.pipeline_mode<synchronous>, transform_indices = @transform_7, window_bounds = array<i64: 128, 128>}, {pipeline_mode = #tpu.pipeline_mode<synchronous>, transform_indices = @transform_8, window_bounds = array<i64: 1, 128>}, {transform_indices = @transform_9, window_bounds = array<i64: 128, 1024>}, {transform_indices = @transform_10, window_bounds = array<i64: 1, 1024>}, {transform_indices = @transform_11, window_bounds = array<i64: 2, 1024>}]} {
    %c0_i32 = arith.constant 0 : i32
    %0 = arith.cmpi eq, %arg1, %c0_i32 : i32
    %1 = arith.extui %0 : i1 to i32
    %c0_i32_0 = arith.constant 0 : i32
    %2 = arith.cmpi ne, %1, %c0_i32_0 : i32
    scf.if %2 {
      %c0_8 = arith.constant 0 : index
      %c0_9 = arith.constant 0 : index
      %10 = vector.load %arg2[%c0_8, %c0_9] : memref<2x1024xf32, #tpu.memory_space<vmem>>, vector<2x1024xf32>
      %c0_10 = arith.constant 0 : index
      %c0_11 = arith.constant 0 : index
      %11 = vector.load %arg3[%c0_10, %c0_11] : memref<1024x128xf32, #tpu.memory_space<vmem>>, vector<1024x128xf32>
      %cst_12 = arith.constant dense<0.000000e+00> : vector<2x128xf32>
      %12 = tpu.matmul %10, %11, %cst_12 {dimension_numbers = #tpu.dot_dimension_numbers<[1], [0], [0], [1], [0, 0, 1, 1], [], []>} : vector<2x1024xf32>, vector<1024x128xf32>, vector<2x128xf32> -> vector<2x128xf32>
      %c0_13 = arith.constant 0 : index
      %c0_14 = arith.constant 0 : index
      %13 = vector.load %arg4[%c0_13, %c0_14] : memref<1x128xf32, #tpu.memory_space<vmem>>, vector<1x128xf32>
      %14 = vector.broadcast %13 : vector<1x128xf32> to vector<2x128xf32>
      %15 = arith.addf %12, %14 : vector<2x128xf32>
      %cst_15 = arith.constant 0.000000e+00 : f32
      %16 = vector.broadcast %cst_15 : f32 to vector<2x128xf32>
      %17 = arith.cmpf ogt, %15, %16 : vector<2x128xf32>
      %cst_16 = arith.constant 0.00999999977 : f32
      %18 = vector.broadcast %cst_16 : f32 to vector<2x128xf32>
      %19 = arith.mulf %18, %15 : vector<2x128xf32>
      %20 = arith.select %17, %15, %19 : vector<2x128xi1>, vector<2x128xf32>
      %c0_17 = arith.constant 0 : index
      %c0_18 = arith.constant 0 : index
      %21 = vector.load %arg5[%c0_17, %c0_18] : memref<128x128xf32, #tpu.memory_space<vmem>>, vector<128x128xf32>
      %cst_19 = arith.constant dense<0.000000e+00> : vector<2x128xf32>
      %22 = tpu.matmul %20, %21, %cst_19 {dimension_numbers = #tpu.dot_dimension_numbers<[1], [0], [0], [1], [0, 0, 1, 1], [], []>} : vector<2x128xf32>, vector<128x128xf32>, vector<2x128xf32> -> vector<2x128xf32>
      %c0_20 = arith.constant 0 : index
      %c0_21 = arith.constant 0 : index
      %23 = vector.load %arg6[%c0_20, %c0_21] : memref<1x128xf32, #tpu.memory_space<vmem>>, vector<1x128xf32>
      %24 = vector.broadcast %23 : vector<1x128xf32> to vector<2x128xf32>
      %25 = arith.addf %22, %24 : vector<2x128xf32>
      %cst_22 = arith.constant 0.000000e+00 : f32
      %26 = vector.broadcast %cst_22 : f32 to vector<2x128xf32>
      %27 = arith.cmpf ogt, %25, %26 : vector<2x128xf32>
      %cst_23 = arith.constant 0.00999999977 : f32
      %28 = vector.broadcast %cst_23 : f32 to vector<2x128xf32>
      %29 = arith.mulf %28, %25 : vector<2x128xf32>
      %30 = arith.select %27, %25, %29 : vector<2x128xi1>, vector<2x128xf32>
      %c0_24 = arith.constant 0 : index
      %c0_25 = arith.constant 0 : index
      %31 = vector.load %arg7[%c0_24, %c0_25] : memref<128x128xf32, #tpu.memory_space<vmem>>, vector<128x128xf32>
      %cst_26 = arith.constant dense<0.000000e+00> : vector<2x128xf32>
      %32 = tpu.matmul %30, %31, %cst_26 {dimension_numbers = #tpu.dot_dimension_numbers<[1], [0], [0], [1], [0, 0, 1, 1], [], []>} : vector<2x128xf32>, vector<128x128xf32>, vector<2x128xf32> -> vector<2x128xf32>
      %c0_27 = arith.constant 0 : index
      %c0_28 = arith.constant 0 : index
      %33 = vector.load %arg8[%c0_27, %c0_28] : memref<1x128xf32, #tpu.memory_space<vmem>>, vector<1x128xf32>
      %34 = vector.broadcast %33 : vector<1x128xf32> to vector<2x128xf32>
      %35 = arith.addf %32, %34 : vector<2x128xf32>
      %cst_29 = arith.constant 0.000000e+00 : f32
      %36 = vector.broadcast %cst_29 : f32 to vector<2x128xf32>
      %37 = arith.cmpf ogt, %35, %36 : vector<2x128xf32>
      %cst_30 = arith.constant 0.00999999977 : f32
      %38 = vector.broadcast %cst_30 : f32 to vector<2x128xf32>
      %39 = arith.mulf %38, %35 : vector<2x128xf32>
      %40 = arith.select %37, %35, %39 : vector<2x128xi1>, vector<2x128xf32>
      %c0_31 = arith.constant 0 : index
      %c0_32 = arith.constant 0 : index
      %41 = vector.load %arg9[%c0_31, %c0_32] : memref<128x128xf32, #tpu.memory_space<vmem>>, vector<128x128xf32>
      %cst_33 = arith.constant dense<0.000000e+00> : vector<2x128xf32>
      %42 = tpu.matmul %40, %41, %cst_33 {dimension_numbers = #tpu.dot_dimension_numbers<[1], [0], [0], [1], [0, 0, 1, 1], [], []>} : vector<2x128xf32>, vector<128x128xf32>, vector<2x128xf32> -> vector<2x128xf32>
      %c0_34 = arith.constant 0 : index
      %c0_35 = arith.constant 0 : index
      %43 = vector.load %arg10[%c0_34, %c0_35] : memref<1x128xf32, #tpu.memory_space<vmem>>, vector<1x128xf32>
      %44 = vector.broadcast %43 : vector<1x128xf32> to vector<2x128xf32>
      %45 = arith.addf %42, %44 : vector<2x128xf32>
      %cst_36 = arith.constant 0.000000e+00 : f32
      %46 = vector.broadcast %cst_36 : f32 to vector<2x128xf32>
      %47 = arith.cmpf ogt, %45, %46 : vector<2x128xf32>
      %cst_37 = arith.constant 0.00999999977 : f32
      %48 = vector.broadcast %cst_37 : f32 to vector<2x128xf32>
      %49 = arith.mulf %48, %45 : vector<2x128xf32>
      %50 = arith.select %47, %45, %49 : vector<2x128xi1>, vector<2x128xf32>
      %c0_38 = arith.constant 0 : index
      %c0_39 = arith.constant 0 : index
      %51 = vector.load %arg14[%c0_38, %c0_39] : memref<2x128xf32, #tpu.memory_space<vmem>>, vector<2x128xf32>
      tpu.vector_store %arg14[%c0_38, %c0_39], %50 {strides = array<i32>} : memref<2x128xf32, #tpu.memory_space<vmem>>, vector<2x128xf32>,
    } else {
    }
    %c0 = arith.constant 0 : index
    %c0_1 = arith.constant 0 : index
    %3 = vector.load %arg14[%c0, %c0_1] : memref<2x128xf32, #tpu.memory_space<vmem>>, vector<2x128xf32>
    %c0_2 = arith.constant 0 : index
    %c0_3 = arith.constant 0 : index
    %4 = vector.load %arg11[%c0_2, %c0_3] : memref<128x1024xf32, #tpu.memory_space<vmem>>, vector<128x1024xf32>
    %cst = arith.constant dense<0.000000e+00> : vector<2x1024xf32>
    %5 = tpu.matmul %3, %4, %cst {dimension_numbers = #tpu.dot_dimension_numbers<[1], [0], [0], [1], [0, 0, 1, 1], [], []>} : vector<2x128xf32>, vector<128x1024xf32>, vector<2x1024xf32> -> vector<2x1024xf32>
    %c0_4 = arith.constant 0 : index
    %c0_5 = arith.constant 0 : index
    %6 = vector.load %arg12[%c0_4, %c0_5] : memref<1x1024xf32, #tpu.memory_space<vmem>>, vector<1x1024xf32>
    %7 = vector.broadcast %6 : vector<1x1024xf32> to vector<2x1024xf32>
    %8 = arith.addf %5, %7 : vector<2x1024xf32>
    %c0_6 = arith.constant 0 : index
    %c0_7 = arith.constant 0 : index
    %9 = vector.load %arg13[%c0_6, %c0_7] : memref<2x1024xf32, #tpu.memory_space<vmem>>, vector<2x1024xf32>
    tpu.vector_store %arg13[%c0_6, %c0_7], %8 {strides = array<i32>} : memref<2x1024xf32, #tpu.memory_space<vmem>>, vector<2x1024xf32>,
    return
  }
  func.func @transform_0(%arg0: i32, %arg1: i32) -> (i32, i32) {
    %c0_i32 = arith.constant 0 : i32
    %c0_i32_0 = arith.constant 0 : i32
    return %arg0, %c0_i32 : i32, i32
  }
  func.func @transform_1(%arg0: i32, %arg1: i32) -> (i32, i32) {
    %c0_i32 = arith.constant 0 : i32
    %c0_i32_0 = arith.constant 0 : i32
    %c0_i32_1 = arith.constant 0 : i32
    return %c0_i32, %c0_i32_0 : i32, i32
  }
  func.func @transform_2(%arg0: i32, %arg1: i32) -> (i32, i32) {
    %c0_i32 = arith.constant 0 : i32
    %c0_i32_0 = arith.constant 0 : i32
    %c0_i32_1 = arith.constant 0 : i32
    return %c0_i32, %c0_i32_0 : i32, i32
  }
  func.func @transform_3(%arg0: i32, %arg1: i32) -> (i32, i32) {
    %c0_i32 = arith.constant 0 : i32
    %c0_i32_0 = arith.constant 0 : i32
    %c0_i32_1 = arith.constant 0 : i32
    return %c0_i32, %c0_i32_0 : i32, i32
  }
  func.func @transform_4(%arg0: i32, %arg1: i32) -> (i32, i32) {
    %c0_i32 = arith.constant 0 : i32
    %c0_i32_0 = arith.constant 0 : i32
    %c0_i32_1 = arith.constant 0 : i32
    return %c0_i32, %c0_i32_0 : i32, i32
  }
  func.func @transform_5(%arg0: i32, %arg1: i32) -> (i32, i32) {
    %c0_i32 = arith.constant 0 : i32
    %c0_i32_0 = arith.constant 0 : i32
    %c0_i32_1 = arith.constant 0 : i32
    return %c0_i32, %c0_i32_0 : i32, i32
  }
  func.func @transform_6(%arg0: i32, %arg1: i32) -> (i32, i32) {
    %c0_i32 = arith.constant 0 : i32
    %c0_i32_0 = arith.constant 0 : i32
    %c0_i32_1 = arith.constant 0 : i32
    return %c0_i32, %c0_i32_0 : i32, i32
  }
  func.func @transform_7(%arg0: i32, %arg1: i32) -> (i32, i32) {
    %c0_i32 = arith.constant 0 : i32
    %c0_i32_0 = arith.constant 0 : i32
    %c0_i32_1 = arith.constant 0 : i32
    return %c0_i32, %c0_i32_0 : i32, i32
  }
  func.func @transform_8(%arg0: i32, %arg1: i32) -> (i32, i32) {
    %c0_i32 = arith.constant 0 : i32
    %c0_i32_0 = arith.constant 0 : i32
    %c0_i32_1 = arith.constant 0 : i32
    return %c0_i32, %c0_i32_0 : i32, i32
  }
  func.func @transform_9(%arg0: i32, %arg1: i32) -> (i32, i32) {
    %c0_i32 = arith.constant 0 : i32
    %c0_i32_0 = arith.constant 0 : i32
    return %c0_i32, %arg1 : i32, i32
  }
  func.func @transform_10(%arg0: i32, %arg1: i32) -> (i32, i32) {
    %c0_i32 = arith.constant 0 : i32
    %c0_i32_0 = arith.constant 0 : i32
    return %c0_i32, %arg1 : i32, i32
  }
  func.func @transform_11(%arg0: i32, %arg1: i32) -> (i32, i32) {
    %c0_i32 = arith.constant 0 : i32
    return %arg0, %arg1 : i32, i32
  }
}

</mosaic_0001>

<bundles_post_ra>
// kernel: mlp_forward.1
= control target key start
LH: loop header
LB: loop body
LE: loop exit
PB: predicated region body
PF: predicated region fallthrough
CT: control target
= control target key end

     0   :  { %16 = vsyncpa [#allocation4], 0  ;;  %s1169_s0 = inlined_call_operand.vmem [shape: f32[2,1024], index: 0, kind: input, shape index: {}]   ;;  %s1170_s1 = inlined_call_operand.hbm [shape: f32[1024,128], index: 1, kind: input, shape index: {}]   ;;  %s1171_s2 = inlined_call_operand.vmem [shape: f32[1,128], index: 2, kind: input, shape index: {}]   ;;  %s1172_s3 = inlined_call_operand.vmem [shape: f32[128,128], index: 3, kind: input, shape index: {}]   ;;  %s1173_s4 = inlined_call_operand.vmem [shape: f32[1,128], index: 4, kind: input, shape index: {}]   ;;  %s1174_s5 = inlined_call_operand.hbm [shape: f32[128,128], index: 5, kind: input, shape index: {}]   ;;  %s1175_s6 = inlined_call_operand.vmem [shape: f32[1,128], index: 6, kind: input, shape index: {}]   ;;  %s1176_s7 = inlined_call_operand.hbm [shape: f32[128,128], index: 7, kind: input, shape index: {}]   ;;  %s1177_s8 = inlined_call_operand.vmem [shape: f32[1,128], index: 8, kind: input, shape index: {}]   ;;  %s1178_s9 = inlined_call_operand.hbm [shape: f32[128,1024], index: 9, kind: input, shape index: {}]   ;;  %s1179_s10 = inlined_call_operand.vmem [shape: f32[1,1024], index: 10, kind: input, shape index: {}]   ;;  %s1180_s11 = inlined_call_operand.vmem [shape: f32[2,1024], index: 11, kind: output, shape index: {}]  }
   0x1   :  { %17 = vsyncpa [#allocation6], 0 }
   0x2   :  { %18 = vsyncpa [#allocation9], 0  ;;  %s44_s19 = sshll.u32 %s1174_s5, 4  ;;  %s1008_s20 = smov [#allocation5]   ;;  %s45_s19 = int_to_ptr.hbm [resolvable:$true] %s44_s19 }
   0x3   :  { %s46_s21 = sshll.u32 %s1008_s20, 4  ;;  %s25_s24 = sshll.u32 %s1170_s1, 4  ;;  %s47_s21 = int_to_ptr.vmem [resolvable:$true] %s46_s21  ;;  %s26_s24 = int_to_ptr.hbm [resolvable:$true] %s25_s24 }
   0x4   :  { %s1009_s25 = smov 128   ;;  %s1010_s26 = smov 8  }
   0x5   :  { %52 = dma.hbm_to_vmem [thread:$0]  %s45_s19, 2048, %s47_s21, [#allocation6], %s1009_s25, %s1009_s25, %s1010_s26  }
   0x6   :  { %s1011_s27 = smov [#allocation3]   ;;  %s59_s12 = sshll.u32 %s1176_s7, 4  ;;  %s60_s12 = int_to_ptr.hbm [resolvable:$true] %s59_s12 }
   0x7   :  { %s27_s28 = sshll.u32 %s1011_s27, 4  ;;  %s74_s14 = sshll.u32 %s1178_s9, 4  ;;  %s28_s28 = int_to_ptr.vmem [resolvable:$true] %s27_s28  ;;  %s75_s14 = int_to_ptr.hbm [resolvable:$true] %s74_s14 }
   0x8   :  { %33 = dma.hbm_to_vmem [thread:$0]  %s26_s24, 16384, %s28_s28, [#allocation4], %s1009_s25, %s1009_s25, %s1010_s26  }
   0x9   :  { %s1012_s15 = smov [#allocation7]   ;;  %s1013_s1 = smov [#allocation8]  }
   0xa   :  { %s61_s16 = sshll.u32 %s1012_s15, 4  ;;  %s76_s17 = sshll.u32 %s1013_s1, 4  ;;  %s62_s16 = int_to_ptr.vmem [resolvable:$true] %s61_s16  ;;  %s77_s17 = int_to_ptr.vmem [resolvable:$true] %s76_s17 }
   0xb   :  { %67 = dma.hbm_to_vmem [thread:$0]  %s60_s12, 2048, %s62_s16, [#allocation6], %s1009_s25, %s1009_s25, %s1010_s26  }
   0xc   :  { %s1014_s18 = smov 1024   ;;  %s1015_s19 = smov 64  }
   0xd   :  { %82 = dma.hbm_to_vmem [thread:$0]  %s75_s14, 16384, %s77_s17, [#allocation9], %s1014_s18, %s1014_s18, %s1015_s19  }
   0xe   :  { %1002 = dma.done.wait [#allocation4], 16384  }
   0xf   :  { %1003 = vsyncadd [#allocation4], 4294950912 }
  0x10   :  { %1004 = dma.done.wait [#allocation6], 4096  }
  0x11   :  { %1005 = vsyncadd [#allocation6], 4294963200 }
  0x12   :  { %1006 = dma.done.wait [#allocation9], 16384  }
  0x13   :  { %1007 = vsyncadd [#allocation9], 4294950912  ;;  %v154_v0 = vld [vmem:[#allocation3 + $0x178] sm:$0xff]  ;;  %v153_v2 = vld [vmem:[#allocation3 + $0x170] sm:$0xff]  ;;  %vm874_vm4 = vcmask 1041408   ;;  %vm876_vm5 = vcmask 1045508  }
  0x14   :  { %v122_v1 = vld [vmem:[#allocation3 + $0x78] sm:$0xff]  ;;  %300 = vmatpush.msra.mxu2 %v154_v0  ;;  %v121_v4 = vld [vmem:[#allocation3 + $0x70] sm:$0xff]  ;;  %v152_v6 = vld [vmem:[#allocation3 + $0x168] sm:$0xff]  ;;  %vm878_vm6 = vcmask 1043456  }
  0x15   :  { %260 = vmatpush.msra.mxu0 %v122_v1  ;;  %v170_v3 = vld [vmem:[#allocation3 + $0x1f8] sm:$0xff]  ;;  %v169_v7 = vld [vmem:[#allocation3 + $0x1f0] sm:$0xff]  ;;  %v120_v8 = vld [vmem:[#allocation3 + $0x68] sm:$0xff] }
  0x16   :  { %v138_v5 = vld [vmem:[#allocation3 + $0xf8] sm:$0xff]  ;;  %320 = vmatpush.msra.mxu3 %v170_v3  ;;  %301 = vmatpush.msra.mxu2 %v153_v2  ;;  %v137_v9 = vld [vmem:[#allocation3 + $0xf0] sm:$0xff]  ;;  %v168_v10 = vld [vmem:[#allocation3 + $0x1e8] sm:$0xff] }
  0x17   :  { %280 = vmatpush.msra.mxu1 %v138_v5  ;;  %261 = vmatpush.msra.mxu0 %v121_v4  ;;  %v151_v11 = vld [vmem:[#allocation3 + $0x160] sm:$0xff]  ;;  %v136_v13 = vld [vmem:[#allocation3 + $0xe8] sm:$0xff]  ;;  %v150_v16 = vld [vmem:[#allocation3 + $0x158] sm:$0xff] }
  0x18   :  { %321 = vmatpush.msra.mxu3 %v169_v7  ;;  %v119_v12 = vld [vmem:[#allocation3 + $0x60] sm:$0xff]  ;;  %302 = vmatpush.msra.mxu2 %v152_v6  ;;  %v118_v17 = vld [vmem:[#allocation3 + $0x58] sm:$0xff]  ;;  %v149_v20 = vld [vmem:[#allocation3 + $0x150] sm:$0xff] }
  0x19   :  { %281 = vmatpush.msra.mxu1 %v137_v9  ;;  %262 = vmatpush.msra.mxu0 %v120_v8  ;;  %v167_v14 = vld [vmem:[#allocation3 + $0x1e0] sm:$0xff]  ;;  %v166_v18 = vld [vmem:[#allocation3 + $0x1d8] sm:$0xff]  ;;  %v117_v21 = vld [vmem:[#allocation3 + $0x50] sm:$0xff] }
  0x1a   :  { %v135_v15 = vld [vmem:[#allocation3 + $0xe0] sm:$0xff]  ;;  %322 = vmatpush.msra.mxu3 %v168_v10  ;;  %303 = vmatpush.msra.mxu2 %v151_v11  ;;  %v134_v19 = vld [vmem:[#allocation3 + $0xd8] sm:$0xff]  ;;  %v165_v22 = vld [vmem:[#allocation3 + $0x1d0] sm:$0xff] }
  0x1b   :  { %282 = vmatpush.msra.mxu1 %v136_v13  ;;  %263 = vmatpush.msra.mxu0 %v119_v12  ;;  %v133_v23 = vld [vmem:[#allocation3 + $0xd0] sm:$0xff]  ;;  %v148_v24 = vld [vmem:[#allocation3 + $0x148] sm:$0xff]  ;;  %v147_v28 = vld [vmem:[#allocation3 + $0x140] sm:$0xff] }
  0x1c   :  { %323 = vmatpush.msra.mxu3 %v167_v14  ;;  %304 = vmatpush.msra.mxu2 %v150_v16  ;;  %v116_v25 = vld [vmem:[#allocation3 + $0x48] sm:$0xff]  ;;  %v115_v29 = vld [vmem:[#allocation3 + $0x40] sm:$0xff]  ;;  %v146_v32 = vld [vmem:[#allocation3 + $0x138] sm:$0xff] }
  0x1d   :  { %283 = vmatpush.msra.mxu1 %v135_v15  ;;  %264 = vmatpush.msra.mxu0 %v118_v17  ;;  %v164_v26 = vld [vmem:[#allocation3 + $0x1c8] sm:$0xff]  ;;  %v163_v30 = vld [vmem:[#allocation3 + $0x1c0] sm:$0xff]  ;;  %v114_v33 = vld [vmem:[#allocation3 + $0x38] sm:$0xff] }
  0x1e   :  { %324 = vmatpush.msra.mxu3 %v166_v18  ;;  %305 = vmatpush.msra.mxu2 %v149_v20  ;;  %v132_v27 = vld [vmem:[#allocation3 + $0xc8] sm:$0xff]  ;;  %v131_v31 = vld [vmem:[#allocation3 + $0xc0] sm:$0xff]  ;;  %v162_v34 = vld [vmem:[#allocation3 + $0x1b8] sm:$0xff] }
  0x1f   :  { %284 = vmatpush.msra.mxu1 %v134_v19  ;;  %265 = vmatpush.msra.mxu0 %v117_v21  ;;  %v130_v35 = vld [vmem:[#allocation3 + $0xb8] sm:$0xff]  ;;  %v145_v36 = vld [vmem:[#allocation3 + $0x130] sm:$0xff]  ;;  %v144_v40 = vld [vmem:[#allocation3 + $0x128] sm:$0xff] }
  0x20   :  { %325 = vmatpush.msra.mxu3 %v165_v22  ;;  %306 = vmatpush.msra.mxu2 %v148_v24  ;;  %v113_v37 = vld [vmem:[#allocation3 + $0x30] sm:$0xff]  ;;  %v112_v41 = vld [vmem:[#allocation3 + $0x28] sm:$0xff]  ;;  %v143_v44 = vld [vmem:[#allocation3 + $0x120] sm:$0xff] }
  0x21   :  { %285 = vmatpush.msra.mxu1 %v133_v23  ;;  %266 = vmatpush.msra.mxu0 %v116_v25  ;;  %v161_v38 = vld [vmem:[#allocation3 + $0x1b0] sm:$0xff]  ;;  %v160_v42 = vld [vmem:[#allocation3 + $0x1a8] sm:$0xff]  ;;  %v111_v45 = vld [vmem:[#allocation3 + $0x20] sm:$0xff] }
  0x22   :  { %326 = vmatpush.msra.mxu3 %v164_v26  ;;  %307 = vmatpush.msra.mxu2 %v147_v28  ;;  %v129_v39 = vld [vmem:[#allocation3 + $0xb0] sm:$0xff]  ;;  %v128_v43 = vld [vmem:[#allocation3 + $0xa8] sm:$0xff]  ;;  %v159_v46 = vld [vmem:[#allocation3 + $0x1a0] sm:$0xff] }
  0x23   :  { %286 = vmatpush.msra.mxu1 %v132_v27  ;;  %267 = vmatpush.msra.mxu0 %v115_v29  ;;  %v127_v47 = vld [vmem:[#allocation3 + $0xa0] sm:$0xff]  ;;  %v142_v48 = vld [vmem:[#allocation3 + $0x118] sm:$0xff]  ;;  %v141_v52 = vld [vmem:[#allocation3 + $0x110] sm:$0xff] }
  0x24   :  { %327 = vmatpush.msra.mxu3 %v163_v30  ;;  %308 = vmatpush.msra.mxu2 %v146_v32  ;;  %v110_v49 = vld [vmem:[#allocation3 + $0x18] sm:$0xff]  ;;  %v109_v53 = vld [vmem:[#allocation3 + $0x10] sm:$0xff]  ;;  %v140_v56 = vld [vmem:[#allocation3 + $0x108] sm:$0xff] }
  0x25   :  { %287 = vmatpush.msra.mxu1 %v131_v31  ;;  %268 = vmatpush.msra.mxu0 %v114_v33  ;;  %v158_v50 = vld [vmem:[#allocation3 + $0x198] sm:$0xff]  ;;  %v157_v54 = vld [vmem:[#allocation3 + $0x190] sm:$0xff]  ;;  %v108_v57 = vld [vmem:[#allocation3 + $0x8] sm:$0xff] }
  0x26   :  { %328 = vmatpush.msra.mxu3 %v162_v34  ;;  %309 = vmatpush.msra.mxu2 %v145_v36  ;;  %v126_v51 = vld [vmem:[#allocation3 + $0x98] sm:$0xff]  ;;  %v125_v55 = vld [vmem:[#allocation3 + $0x90] sm:$0xff]  ;;  %v156_v58 = vld [vmem:[#allocation3 + $0x188] sm:$0xff] }
  0x27   :  { %288 = vmatpush.msra.mxu1 %v130_v35  ;;  %269 = vmatpush.msra.mxu0 %v113_v37  ;;  %v124_v59 = vld [vmem:[#allocation3 + $0x88] sm:$0xff]  ;;  %v139_v60 = vld [vmem:[#allocation3 + $0x100] sm:$0xff]  ;;  %v218_v62 = vld [vmem:[#allocation3 + $0x378] sm:$0xff] }
  0x28   :  { %329 = vmatpush.msra.mxu3 %v161_v38  ;;  %310 = vmatpush.msra.mxu2 %v144_v40  ;;  %v107_v61 = vld [vmem:[#allocation3] sm:$0xff]  ;;  %v186_v0 = vld [vmem:[#allocation3 + $0x278] sm:$0xff]  ;;  %v217_v2 = vld [vmem:[#allocation3 + $0x370] sm:$0xff] }
  0x29   :  { %289 = vmatpush.msra.mxu1 %v129_v39  ;;  %270 = vmatpush.msra.mxu0 %v112_v41  ;;  %v155_v63 = vld [vmem:[#allocation3 + $0x180] sm:$0xff]  ;;  %v234_v1 = vld [vmem:[#allocation3 + $0x3f8] sm:$0xff]  ;;  %v185_v4 = vld [vmem:[#allocation3 + $0x270] sm:$0xff] }
  0x2a   :  { %330 = vmatpush.msra.mxu3 %v160_v42  ;;  %311 = vmatpush.msra.mxu2 %v143_v44  ;;  %v123_v3 = vld [vmem:[#allocation3 + $0x80] sm:$0xff]  ;;  %v202_v5 = vld [vmem:[#allocation3 + $0x2f8] sm:$0xff]  ;;  %v216_v6 = vld [vmem:[#allocation3 + $0x368] sm:$0xff] }
  0x2b   :  { %290 = vmatpush.msra.mxu1 %v128_v43  ;;  %271 = vmatpush.msra.mxu0 %v111_v45  ;;  %v233_v7 = vld [vmem:[#allocation3 + $0x3f0] sm:$0xff]  ;;  %v184_v8 = vld [vmem:[#allocation3 + $0x268] sm:$0xff]  ;;  %v215_v10 = vld [vmem:[#allocation3 + $0x360] sm:$0xff] }
  0x2c   :  { %331 = vmatpush.msra.mxu3 %v159_v46  ;;  %312 = vmatpush.msra.mxu2 %v142_v48  ;;  %v201_v9 = vld [vmem:[#allocation3 + $0x2f0] sm:$0xff]  ;;  %v232_v11 = vld [vmem:[#allocation3 + $0x3e8] sm:$0xff]  ;;  %v183_v12 = vld [vmem:[#allocation3 + $0x260] sm:$0xff] }
  0x2d   :  { %291 = vmatpush.msra.mxu1 %v127_v47  ;;  %272 = vmatpush.msra.mxu0 %v110_v49  ;;  %v200_v13 = vld [vmem:[#allocation3 + $0x2e8] sm:$0xff]  ;;  %v105_v14 = vld [vmem:[%s1169_s0] sm:$0xff]  ;;  %v231_v16 = vld [vmem:[#allocation3 + $0x3e0] sm:$0xff] }
  0x2e   :  { %332 = vmatpush.msra.mxu3 %v158_v50  ;;  %313 = vmatpush.msra.mxu2 %v141_v52  ;;  %v214_v15 = vld [vmem:[#allocation3 + $0x358] sm:$0xff]  ;;  %241 = vst [vmem:[#allocation1] ss:$4 sm:$0xff] %v105_v14  ;;  %v199_v18 = vld [vmem:[#allocation3 + $0x2e0] sm:$0xff]  ;;  %v213_v19 = vld [vmem:[#allocation3 + $0x350] sm:$0xff] }
  0x2f   :  { %292 = vmatpush.msra.mxu1 %v126_v51  ;;  %273 = vmatpush.msra.mxu0 %v109_v53  ;;  %v182_v17 = vld [vmem:[#allocation3 + $0x258] sm:$0xff]  ;;  %v181_v21 = vld [vmem:[#allocation3 + $0x250] sm:$0xff]  ;;  %v212_v23 = vld [vmem:[#allocation3 + $0x348] sm:$0xff] }
  0x30   :  { %333 = vmatpush.msra.mxu3 %v157_v54  ;;  %314 = vmatpush.msra.mxu2 %v140_v56  ;;  %v230_v20 = vld [vmem:[#allocation3 + $0x3d8] sm:$0xff]  ;;  %v229_v24 = vld [vmem:[#allocation3 + $0x3d0] sm:$0xff]  ;;  %v180_v26 = vld [vmem:[#allocation3 + $0x248] sm:$0xff] }
  0x31   :  { %293 = vmatpush.msra.mxu1 %v125_v55  ;;  %274 = vmatpush.msra.mxu0 %v108_v57  ;;  %v198_v22 = vld [vmem:[#allocation3 + $0x2d8] sm:$0xff]  ;;  %v197_v27 = vld [vmem:[#allocation3 + $0x2d0] sm:$0xff]  ;;  %v211_v28 = vld [vmem:[#allocation3 + $0x340] sm:$0xff] }
  0x32   :  { %334 = vmatpush.msra.mxu3 %v156_v58  ;;  %315 = vmatpush.msra.mxu2 %v139_v60  ;;  %v106_v25 = vld [vmem:[%s1169_s0 + $0x8] sm:$0xff]  ;;  %v228_v29 = vld [vmem:[#allocation3 + $0x3c8] sm:$0xff]  ;;  %v209_v36 = vld [vmem:[#allocation3 + $0x330] sm:$0xff] }
  0x33   :  { %294 = vmatpush.msra.mxu1 %v124_v59  ;;  %275 = vmatpush.msra.mxu0 %v107_v61  ;;  %243 = vst [vmem:[#allocation1 + $0x20] ss:$4 sm:$0xff] %v106_v25  ;;  %v179_v30 = vld [vmem:[#allocation3 + $0x240] sm:$0xff]  ;;  %v196_v31 = vld [vmem:[#allocation3 + $0x2c8] sm:$0xff]  ;;  %v210_v32 = vld [vmem:[#allocation3 + $0x338] sm:$0xff] }
  0x34   :  { %380 = vmatpush.msrb.mxu2 %v218_v62  ;;  %335 = vmatpush.msra.mxu3 %v155_v63  ;;  %v227_v33 = vld [vmem:[#allocation3 + $0x3c0] sm:$0xff]  ;;  %v178_v34 = vld [vmem:[#allocation3 + $0x238] sm:$0xff]  ;;  %v177_v38 = vld [vmem:[#allocation3 + $0x230] sm:$0xff] }
  0x35   :  { %340 = vmatpush.msrb.mxu0 %v186_v0  ;;  %295 = vmatpush.msra.mxu1 %v123_v3  ;;  %v195_v35 = vld [vmem:[#allocation3 + $0x2c0] sm:$0xff]  ;;  %v226_v37 = vld [vmem:[#allocation3 + $0x3b8] sm:$0xff]  ;;  %v208_v40 = vld [vmem:[#allocation3 + $0x328] sm:$0xff] }
  0x36   :  { %400 = vmatpush.msrb.mxu3 %v234_v1  ;;  %381 = vmatpush.msrb.mxu2 %v217_v2  ;;  %v194_v39 = vld [vmem:[#allocation3 + $0x2b8] sm:$0xff]  ;;  %v225_v41 = vld [vmem:[#allocation3 + $0x3b0] sm:$0xff]  ;;  %v176_v42 = vld [vmem:[#allocation3 + $0x228] sm:$0xff] }
  0x37   :  { %341 = vmatpush.msrb.mxu0 %v185_v4  ;;  %360 = vmatpush.msrb.mxu1 %v202_v5  ;;  %v193_v43 = vld [vmem:[#allocation3 + $0x2b0] sm:$0xff]  ;;  %v207_v44 = vld [vmem:[#allocation3 + $0x320] sm:$0xff]  ;;  %v224_v45 = vld [vmem:[#allocation3 + $0x3a8] sm:$0xff] }
  0x38   :  { %382 = vmatpush.msrb.mxu2 %v216_v6  ;;  %401 = vmatpush.msrb.mxu3 %v233_v7  ;;  %v246_v46 = vld.sshfl [vmem:[#allocation1 + $0x10] sm:$0xff pattern:$0x73625140]  ;;  %v206_v49 = vld [vmem:[#allocation3 + $0x318] sm:$0xff]  ;;  %v205_v55 = vld [vmem:[#allocation3 + $0x310] sm:$0xff] }
  0x39   :  { %342 = vmatpush.msrb.mxu0 %v184_v8  ;;  %361 = vmatpush.msrb.mxu1 %v201_v9  ;;  %v175_v47 = vld [vmem:[#allocation3 + $0x220] sm:$0xff]  ;;  %v192_v48 = vld [vmem:[#allocation3 + $0x2a8] sm:$0xff]  ;;  %v244_v51 = vld.sshfl [vmem:[#allocation1] sm:$0xff pattern:$0x73625140] }
  0x3a   :  { %383 = vmatpush.msrb.mxu2 %v215_v10  ;;  %402 = vmatpush.msrb.mxu3 %v232_v11  ;;  %v223_v50 = vld [vmem:[#allocation3 + $0x3a0] sm:$0xff]  ;;  %v247_v52 = vld.sshfl [vmem:[#allocation1 + $0x18] sm:$0xff pattern:$0x73625140]  ;;  %v174_v53 = vld [vmem:[#allocation3 + $0x218] sm:$0xff] }
  0x3b   :  { %343 = vmatpush.msrb.mxu0 %v183_v12  ;;  %362 = vmatpush.msrb.mxu1 %v200_v13  ;;  %v191_v54 = vld [vmem:[#allocation3 + $0x2a0] sm:$0xff]  ;;  %v222_v56 = vld [vmem:[#allocation3 + $0x398] sm:$0xff]  ;;  %v173_v58 = vld [vmem:[#allocation3 + $0x210] sm:$0xff] }
  0x3c   :  { %384 = vmatpush.msrb.mxu2 %v214_v15  ;;  %403 = vmatpush.msrb.mxu3 %v231_v16  ;;  %v245_v57 = vld.sshfl [vmem:[#allocation1 + $0x8] sm:$0xff pattern:$0x73625140]  ;;  %v204_v60 = vld [vmem:[#allocation3 + $0x308] sm:$0xff]  ;;  %v221_v61 = vld [vmem:[#allocation3 + $0x390] sm:$0xff] }
  0x3d   :  { %344 = vmatpush.msrb.mxu0 %v182_v17  ;;  %363 = vmatpush.msrb.mxu1 %v199_v18  ;;  %v190_v59 = vld [vmem:[#allocation3 + $0x298] sm:$0xff]  ;;  %v172_v62 = vld [vmem:[#allocation3 + $0x208] sm:$0xff]  ;;  %v189_v63 = vld [vmem:[#allocation3 + $0x290] sm:$0xff] }
  0x3e   :  { %385 = vmatpush.msrb.mxu2 %v213_v19  ;;  %404 = vmatpush.msrb.mxu3 %v230_v20  ;;  %v203_v0 = vld [vmem:[#allocation3 + $0x300] sm:$0xff]  ;;  %v220_v1 = vld [vmem:[#allocation3 + $0x388] sm:$0xff]  ;;  %v248_v6 = vld.sshfl [vmem:[#allocation1 + $0x20] sm:$0xff pattern:$0x73625140] }
  0x3f   :  { %345 = vmatpush.msrb.mxu0 %v181_v21  ;;  %364 = vmatpush.msrb.mxu1 %v198_v22  ;;  %v250_v2 = vld.sshfl [vmem:[#allocation1 + $0x30] sm:$0xff pattern:$0x73625140]  ;;  %v251_v7 = vld.sshfl [vmem:[#allocation1 + $0x38] sm:$0xff pattern:$0x73625140] }
  0x40   :  { %386 = vmatpush.msrb.mxu2 %v212_v23  ;;  %405 = vmatpush.msrb.mxu3 %v229_v24  ;;  %v171_v3 = vld [vmem:[#allocation3 + $0x200] sm:$0xff]  ;;  %v188_v4 = vld [vmem:[#allocation3 + $0x288] sm:$0xff]  ;;  %v435_v13 = vld [vmem:[%s1172_s3 + $0x60] sm:$0xff] }
  0x41   :  { %346 = vmatpush.msrb.mxu0 %v180_v26  ;;  %365 = vmatpush.msrb.mxu1 %v197_v27  ;;  %v219_v5 = vld [vmem:[#allocation3 + $0x380] sm:$0xff]  ;;  %v438_v9 = vld [vmem:[%s1172_s3 + $0x78] sm:$0xff]  ;;  %v431_v17 = vld [vmem:[%s1172_s3 + $0x40] sm:$0xff] }
  0x42   :  { %387 = vmatpush.msrb.mxu2 %v211_v28  ;;  %406 = vmatpush.msrb.mxu3 %v228_v29  ;;  %v187_v8 = vld [vmem:[#allocation3 + $0x280] sm:$0xff]  ;;  %v434_v14 = vld [vmem:[%s1172_s3 + $0x58] sm:$0xff]  ;;  %v427_v21 = vld [vmem:[%s1172_s3 + $0x20] sm:$0xff] }
  0x43   :  { %347 = vmatpush.msrb.mxu0 %v179_v30  ;;  %366 = vmatpush.msrb.mxu1 %v196_v31  ;;  %v249_v10 = vld.sshfl [vmem:[#allocation1 + $0x28] sm:$0xff pattern:$0x73625140]  ;;  %v437_v11 = vld [vmem:[%s1172_s3 + $0x70] sm:$0xff]  ;;  %v430_v18 = vld [vmem:[%s1172_s3 + $0x38] sm:$0xff] }
  0x44   :  { %388 = vmatpush.msrb.mxu2 %v210_v32  ;;  %407 = vmatpush.msrb.mxu3 %v227_v33  ;;  %v436_v12 = vld [vmem:[%s1172_s3 + $0x68] sm:$0xff]  ;;  %v433_v15 = vld [vmem:[%s1172_s3 + $0x50] sm:$0xff]  ;;  %v426_v22 = vld [vmem:[%s1172_s3 + $0x18] sm:$0xff] }
  0x45   :  { %348 = vmatpush.msrb.mxu0 %v178_v34  ;;  %367 = vmatpush.msrb.mxu1 %v195_v35  ;;  %v432_v16 = vld [vmem:[%s1172_s3 + $0x48] sm:$0xff]  ;;  %v429_v19 = vld [vmem:[%s1172_s3 + $0x30] sm:$0xff]  ;;  %v423_v25 = vld [vmem:[%s1172_s3] sm:$0xff] }
  0x46   :  { %389 = vmatpush.msrb.mxu2 %v209_v36  ;;  %408 = vmatpush.msrb.mxu3 %v226_v37  ;;  %v428_v20 = vld [vmem:[%s1172_s3 + $0x28] sm:$0xff]  ;;  %v425_v23 = vld [vmem:[%s1172_s3 + $0x10] sm:$0xff]  ;;  %v480_v27 = vld [vmem:[#allocation5 + $0x70] sm:$0xff] }
  0x47   :  { %349 = vmatpush.msrb.mxu0 %v177_v38  ;;  %368 = vmatpush.msrb.mxu1 %v194_v39  ;;  %v424_v24 = vld [vmem:[%s1172_s3 + $0x8] sm:$0xff]  ;;  %v479_v28 = vld [vmem:[#allocation5 + $0x68] sm:$0xff]  ;;  %v902_v31 = vld [vmem:[%s1171_s2] ss:$0 sm:$0xff] }
  0x48   :  { %390 = vmatpush.msrb.mxu2 %v208_v40  ;;  %409 = vmatpush.msrb.mxu3 %v225_v41  ;;  %v481_v26 = vld [vmem:[#allocation5 + $0x78] sm:$0xff]  ;;  %v478_v29 = vld [vmem:[#allocation5 + $0x60] sm:$0xff]  ;;  %v476_v32 = vld [vmem:[#allocation5 + $0x50] sm:$0xff] }
  0x49   :  { %350 = vmatpush.msrb.mxu0 %v176_v42  ;;  %369 = vmatpush.msrb.mxu1 %v193_v43  ;;  %v477_v30 = vld [vmem:[#allocation5 + $0x58] sm:$0xff]  ;;  %v475_v34 = vld [vmem:[#allocation5 + $0x48] sm:$0xff]  ;;  %v474_v36 = vld [vmem:[#allocation5 + $0x40] sm:$0xff] }
  0x4a   :  { %391 = vmatpush.msrb.mxu2 %v207_v44  ;;  %410 = vmatpush.msrb.mxu3 %v224_v45  ;;  %v473_v40 = vld [vmem:[#allocation5 + $0x38] sm:$0xff]  ;;  %v472_v42 = vld [vmem:[#allocation5 + $0x30] sm:$0xff]  ;;  %v471_v45 = vld [vmem:[#allocation5 + $0x28] sm:$0xff] }
  0x4b   :  { %316 = vmatmul.f32.vlgmr.msra.gmra.mxu2 %v246_v46  ;;  %351 = vmatpush.msrb.mxu0 %v175_v47  ;;  %v470_v47 = vld [vmem:[#allocation5 + $0x20] sm:$0xff] }
  0x4c   :  { %370 = vmatpush.msrb.mxu1 %v192_v48  ;;  %392 = vmatpush.msrb.mxu2 %v206_v49 }
  0x4d   :  { %411 = vmatpush.msrb.mxu3 %v223_v50  ;;  %276 = vmatmul.f32.vlgmr.msra.gmra.mxu0 %v244_v51  ;;  %v469_v50 = vld [vmem:[#allocation5 + $0x18] sm:$0xff] }
  0x4e   :  { %336 = vmatmul.f32.vlgmr.msra.gmra.mxu3 %v247_v52  ;;  %352 = vmatpush.msrb.mxu0 %v174_v53 }
  0x4f   :  { %371 = vmatpush.msrb.mxu1 %v191_v54  ;;  %393 = vmatpush.msrb.mxu2 %v205_v55 }
  0x50   :  { %412 = vmatpush.msrb.mxu3 %v222_v56  ;;  %296 = vmatmul.f32.vlgmr.msra.gmra.mxu1 %v245_v57 }
  0x51   :  { %353 = vmatpush.msrb.mxu0 %v173_v58  ;;  %372 = vmatpush.msrb.mxu1 %v190_v59  ;;  %v468_v58 = vld [vmem:[#allocation5 + $0x10] sm:$0xff]  ;;  %v467_v59 = vld [vmem:[#allocation5 + $0x8] sm:$0xff] }
  0x52   :  { %394 = vmatpush.msrb.mxu2 %v204_v60  ;;  %413 = vmatpush.msrb.mxu3 %v221_v61  ;;  %v466_v60 = vld [vmem:[#allocation5] sm:$0xff]  ;;  %v524_v61 = vld [vmem:[#allocation7 + $0x78] sm:$0xff] }
  0x53   :  { %354 = vmatpush.msrb.mxu0 %v172_v62  ;;  %373 = vmatpush.msrb.mxu1 %v189_v63  ;;  %v523_v62 = vld [vmem:[#allocation7 + $0x70] sm:$0xff]  ;;  %v522_v63 = vld [vmem:[#allocation7 + $0x68] sm:$0xff] }
  0x54   :  { %395 = vmatpush.msrb.mxu2 %v203_v0  ;;  %414 = vmatpush.msrb.mxu3 %v220_v1  ;;  %v521_v0 = vld [vmem:[#allocation7 + $0x60] sm:$0xff]  ;;  %v520_v1 = vld [vmem:[#allocation7 + $0x58] sm:$0xff] }
  0x55   :  { %396 = vmatmul.f32.vlgmr.msrb.gmra.mxu2 %v250_v2  ;;  %355 = vmatpush.msrb.mxu0 %v171_v3  ;;  %v519_v2 = vld [vmem:[#allocation7 + $0x50] sm:$0xff]  ;;  %v518_v3 = vld [vmem:[#allocation7 + $0x48] sm:$0xff] }
  0x56   :  { %374 = vmatpush.msrb.mxu1 %v188_v4  ;;  %415 = vmatpush.msrb.mxu3 %v219_v5  ;;  %v517_v4 = vld [vmem:[#allocation7 + $0x40] sm:$0xff]  ;;  %v516_v5 = vld [vmem:[#allocation7 + $0x38] sm:$0xff] }
  0x57   :  { %356 = vmatmul.f32.vlgmr.msrb.gmra.mxu0 %v248_v6  ;;  %416 = vmatmul.f32.vlgmr.msrb.gmra.mxu3 %v251_v7  ;;  %v515_v6 = vld [vmem:[#allocation7 + $0x30] sm:$0xff]  ;;  %v514_v7 = vld [vmem:[#allocation7 + $0x28] sm:$0xff] }
  0x58   :  { %375 = vmatpush.msrb.mxu1 %v187_v8  ;;  %443 = vmatpush.msra.mxu0 %v438_v9  ;;  %v513_v8 = vld [vmem:[#allocation7 + $0x20] sm:$0xff]  ;;  %v512_v9 = vld [vmem:[#allocation7 + $0x18] sm:$0xff] }
  0x59   :  { %376 = vmatmul.f32.vlgmr.msrb.gmra.mxu1 %v249_v10  ;;  %529 = vmatpush.msra.mxu2 %v524_v61  ;;  %v903_v10 = vld [vmem:[%s1173_s4] ss:$0 sm:$0xff]  ;;  %v597_v61 = vld [vmem:[#allocation8 + $0x158] sm:$0xff] }
  0x5a   :  { %444 = vmatpush.msra.mxu0 %v437_v11  ;;  %486 = vmatpush.msra.mxu1 %v481_v26  ;;  %v658_v26 = vld [vmem:[#allocation8 + $0x340] sm:$0xff] }
  0x5b   :  { %530 = vmatpush.msra.mxu2 %v523_v62  ;;  %v586_v62 = vld [vmem:[#allocation8 + $0x100] sm:$0xff] }
  0x5c   :  { %445 = vmatpush.msra.mxu0 %v436_v12  ;;  %487 = vmatpush.msra.mxu1 %v480_v27  ;;  %v659_v27 = vld [vmem:[#allocation8 + $0x348] sm:$0xff] }
  0x5d   :  { %531 = vmatpush.msra.mxu2 %v522_v63  ;;  %v587_v63 = vld [vmem:[#allocation8 + $0x108] sm:$0xff] }
  0x5e   :  { %446 = vmatpush.msra.mxu0 %v435_v13  ;;  %488 = vmatpush.msra.mxu1 %v479_v28  ;;  %v660_v28 = vld [vmem:[#allocation8 + $0x350] sm:$0xff] }
  0x5f   :  { %532 = vmatpush.msra.mxu2 %v521_v0  ;;  %v588_v0 = vld [vmem:[#allocation8 + $0x110] sm:$0xff] }
  0x60   :  { %447 = vmatpush.msra.mxu0 %v434_v14  ;;  %489 = vmatpush.msra.mxu1 %v478_v29  ;;  %v661_v29 = vld [vmem:[#allocation8 + $0x358] sm:$0xff] }
  0x61   :  { %533 = vmatpush.msra.mxu2 %v520_v1  ;;  %v589_v1 = vld [vmem:[#allocation8 + $0x118] sm:$0xff] }
  0x62   :  { %448 = vmatpush.msra.mxu0 %v433_v15  ;;  %490 = vmatpush.msra.mxu1 %v477_v30  ;;  %v511_v15 = vld [vmem:[#allocation7 + $0x10] sm:$0xff]  ;;  %v650_v30 = vld [vmem:[#allocation8 + $0x300] sm:$0xff] }
  0x63   :  { %534 = vmatpush.msra.mxu2 %v519_v2  ;;  %v578_v2 = vld [vmem:[#allocation8 + $0xc0] sm:$0xff] }
  0x64   :  { %449 = vmatpush.msra.mxu0 %v432_v16  ;;  %491 = vmatpush.msra.mxu1 %v476_v32  ;;  %v510_v16 = vld [vmem:[#allocation7 + $0x8] sm:$0xff]  ;;  %v652_v32 = vld [vmem:[#allocation8 + $0x310] sm:$0xff] }
  0x65   :  { %535 = vmatpush.msra.mxu2 %v518_v3  ;;  %v579_v3 = vld [vmem:[#allocation8 + $0xc8] sm:$0xff] }
  0x66   :  { %450 = vmatpush.msra.mxu0 %v431_v17  ;;  %492 = vmatpush.msra.mxu1 %v475_v34  ;;  %v509_v17 = vld [vmem:[#allocation7] sm:$0xff] }
  0x67   :  { %536 = vmatpush.msra.mxu2 %v517_v4  ;;  %v642_v34 = vld [vmem:[#allocation8 + $0x2c0] sm:$0xff]  ;;  %v904_v4 = vld [vmem:[%s1175_s6] ss:$0 sm:$0xff] }
  0x68   :  { %451 = vmatpush.msra.mxu0 %v430_v18  ;;  %493 = vmatpush.msra.mxu1 %v474_v36  ;;  %v674_v18 = vld [vmem:[#allocation8 + $0x3c0] sm:$0xff]  ;;  %v644_v36 = vld [vmem:[#allocation8 + $0x2d0] sm:$0xff] }
  0x69   :  { %537 = vmatpush.msra.mxu2 %v516_v5  ;;  %700 = vmatpush.msra.mxu3 %v674_v18  ;;  %v580_v5 = vld [vmem:[#allocation8 + $0xd0] sm:$0xff]  ;;  %v555_v18 = vld [vmem:[#allocation8 + $0x8] sm:$0xff] }
  0x6a   :  { %452 = vmatpush.msra.mxu0 %v429_v19  ;;  %494 = vmatpush.msra.mxu1 %v473_v40  ;;  %v675_v19 = vld [vmem:[#allocation8 + $0x3c8] sm:$0xff]  ;;  %v636_v40 = vld [vmem:[#allocation8 + $0x290] sm:$0xff] }
  0x6b   :  { %538 = vmatpush.msra.mxu2 %v515_v6  ;;  %v581_v6 = vld [vmem:[#allocation8 + $0xd8] sm:$0xff] }
  0x6c   :  { %453 = vmatpush.msra.mxu0 %v428_v20  ;;  %495 = vmatpush.msra.mxu1 %v472_v42  ;;  %v676_v20 = vld [vmem:[#allocation8 + $0x3d0] sm:$0xff]  ;;  %v626_v42 = vld [vmem:[#allocation8 + $0x240] sm:$0xff] }
  0x6d   :  { %539 = vmatpush.msra.mxu2 %v514_v7  ;;  %v570_v7 = vld [vmem:[#allocation8 + $0x80] sm:$0xff] }
  0x6e   :  { %454 = vmatpush.msra.mxu0 %v427_v21  ;;  %496 = vmatpush.msra.mxu1 %v471_v45  ;;  %v677_v21 = vld [vmem:[#allocation8 + $0x3d8] sm:$0xff] }
  0x6f   :  { %540 = vmatpush.msra.mxu2 %v513_v8  ;;  %v629_v45 = vld [vmem:[#allocation8 + $0x258] sm:$0xff]  ;;  %v571_v8 = vld [vmem:[#allocation8 + $0x88] sm:$0xff] }
  0x70   :  { %455 = vmatpush.msra.mxu0 %v426_v22  ;;  %497 = vmatpush.msra.mxu1 %v470_v47  ;;  %v666_v22 = vld [vmem:[#allocation8 + $0x380] sm:$0xff]  ;;  %v619_v47 = vld [vmem:[#allocation8 + $0x208] sm:$0xff] }
  0x71   :  { %541 = vmatpush.msra.mxu2 %v512_v9  ;;  %701 = vmatpush.msra.mxu3 %v666_v22  ;;  %v572_v9 = vld [vmem:[#allocation8 + $0x90] sm:$0xff]  ;;  %v678_v22 = vld [vmem:[#allocation8 + $0x3e0] sm:$0xff] }
  0x72   :  { %456 = vmatpush.msra.mxu0 %v425_v23  ;;  %498 = vmatpush.msra.mxu1 %v469_v50  ;;  %v667_v23 = vld [vmem:[#allocation8 + $0x388] sm:$0xff]  ;;  %v610_v50 = vld [vmem:[#allocation8 + $0x1c0] sm:$0xff] }
  0x73   :  { %542 = vmatpush.msra.mxu2 %v511_v15  ;;  %702 = vmatpush.msra.mxu3 %v658_v26  ;;  %v564_v15 = vld [vmem:[#allocation8 + $0x50] sm:$0xff]  ;;  %v681_v26 = vld [vmem:[#allocation8 + $0x3f8] sm:$0xff] }
  0x74   :  { %457 = vmatpush.msra.mxu0 %v424_v24  ;;  %499 = vmatpush.msra.mxu1 %v468_v58  ;;  %v668_v24 = vld [vmem:[#allocation8 + $0x390] sm:$0xff]  ;;  %v594_v58 = vld [vmem:[#allocation8 + $0x140] sm:$0xff] }
  0x75   :  { %543 = vmatpush.msra.mxu2 %v510_v16  ;;  %703 = vmatpush.msra.mxu3 %v650_v30  ;;  %v565_v16 = vld [vmem:[#allocation8 + $0x58] sm:$0xff] }
  0x76   :  { %458 = vmatpush.msra.mxu0 %v423_v25  ;;  %500 = vmatpush.msra.mxu1 %v467_v59  ;;  %v669_v25 = vld [vmem:[#allocation8 + $0x398] sm:$0xff]  ;;  %v595_v59 = vld [vmem:[#allocation8 + $0x148] sm:$0xff] }
  0x77   :  { %544 = vmatpush.msra.mxu2 %v509_v17  ;;  %704 = vmatpush.msra.mxu3 %v642_v34  ;;  %v554_v17 = vld [vmem:[#allocation8] sm:$0xff]  ;;  %v673_v30 = vld [vmem:[#allocation8 + $0x3b8] sm:$0xff] }
  0x78   :  { %501 = vmatpush.msra.mxu1 %v466_v60  ;;  %720 = vmatpush.msrb.mxu0 %v675_v19  ;;  %v596_v60 = vld [vmem:[#allocation8 + $0x150] sm:$0xff]  ;;  %v665_v34 = vld [vmem:[#allocation8 + $0x378] sm:$0xff] }
  0x79   :  { %760 = vmatpush.msrb.mxu2 %v677_v21  ;;  %v557_v21 = vld [vmem:[#allocation8 + $0x18] sm:$0xff] }
  0x7a   :  { %740 = vmatpush.msrb.mxu1 %v676_v20  ;;  %721 = vmatpush.msrb.mxu0 %v667_v23  ;;  %v556_v20 = vld [vmem:[#allocation8 + $0x10] sm:$0xff] }
  0x7b   :  { %761 = vmatpush.msrb.mxu2 %v669_v25  ;;  %v680_v25 = vld [vmem:[#allocation8 + $0x3f0] sm:$0xff] }
  0x7c   :  { %741 = vmatpush.msrb.mxu1 %v668_v24  ;;  %722 = vmatpush.msrb.mxu0 %v659_v27  ;;  %v679_v24 = vld [vmem:[#allocation8 + $0x3e8] sm:$0xff]  ;;  %v670_v27 = vld [vmem:[#allocation8 + $0x3a0] sm:$0xff] }
  0x7d   :  { %762 = vmatpush.msrb.mxu2 %v661_v29  ;;  %v672_v29 = vld [vmem:[#allocation8 + $0x3b0] sm:$0xff] }
  0x7e   :  { %742 = vmatpush.msrb.mxu1 %v660_v28  ;;  %v671_v28 = vld [vmem:[#allocation8 + $0x3a8] sm:$0xff] }
  0x80   :  { %743 = vmatpush.msrb.mxu1 %v652_v32  ;;  %v663_v32 = vld [vmem:[#allocation8 + $0x368] sm:$0xff] }
  0x82   :  { %744 = vmatpush.msrb.mxu1 %v644_v36  ;;  %v655_v36 = vld [vmem:[#allocation8 + $0x328] sm:$0xff] }
  0x84   :  { %745 = vmatpush.msrb.mxu1 %v636_v40  ;;  %v647_v40 = vld [vmem:[#allocation8 + $0x2e8] sm:$0xff] }
  0xca   :  { %v277_v33 = vpop.f32.mrf.mxu0 }
  0xcb   :  { %v278_v35 = vadd.f32 %v902_v31, %v277_v33  ;;  %v651_v31 = vld [vmem:[#allocation8 + $0x308] sm:$0xff]  ;;  %v653_v33 = vld [vmem:[#allocation8 + $0x318] sm:$0xff] }
  0xcc   :  { %723 = vmatpush.msrb.mxu0 %v651_v31  ;;  %763 = vmatpush.msrb.mxu2 %v653_v33  ;;  %v662_v31 = vld [vmem:[#allocation8 + $0x360] sm:$0xff]  ;;  %v664_v33 = vld [vmem:[#allocation8 + $0x370] sm:$0xff] }
  0xcd   :  { %v297_v37 = vpop.f32.mrf.mxu1 }
  0xce   :  { %v298_v38 = vadd.f32 %v297_v37, %v278_v35  ;;  %v317_v39 = vpop.f32.mrf.mxu2  ;;  %v643_v35 = vld [vmem:[#allocation8 + $0x2c8] sm:$0xff]  ;;  %v645_v37 = vld [vmem:[#allocation8 + $0x2d8] sm:$0xff] }
  0xcf   :  { %724 = vmatpush.msrb.mxu0 %v643_v35  ;;  %764 = vmatpush.msrb.mxu2 %v645_v37  ;;  %v654_v35 = vld [vmem:[#allocation8 + $0x320] sm:$0xff]  ;;  %v656_v37 = vld [vmem:[#allocation8 + $0x330] sm:$0xff] }
  0xd0   :  { %v318_v41 = vadd.f32 %v317_v39, %v298_v38  ;;  %v634_v38 = vld [vmem:[#allocation8 + $0x280] sm:$0xff]  ;;  %v635_v39 = vld [vmem:[#allocation8 + $0x288] sm:$0xff] }
  0xd1   :  { %v337_v43 = vpop.f32.mrf.mxu3  ;;  %705 = vmatpush.msra.mxu3 %v634_v38  ;;  %725 = vmatpush.msrb.mxu0 %v635_v39  ;;  %v657_v38 = vld [vmem:[#allocation8 + $0x338] sm:$0xff]  ;;  %v646_v39 = vld [vmem:[#allocation8 + $0x2e0] sm:$0xff] }
  0xd2   :  { %v338_v44 = vadd.f32 %v337_v43, %v318_v41  ;;  %v637_v41 = vld [vmem:[#allocation8 + $0x298] sm:$0xff]  ;;  %v627_v43 = vld [vmem:[#allocation8 + $0x248] sm:$0xff] }
  0xd3   :  { %765 = vmatpush.msrb.mxu2 %v637_v41  ;;  %706 = vmatpush.msra.mxu3 %v626_v42  ;;  %v648_v41 = vld [vmem:[#allocation8 + $0x2f0] sm:$0xff]  ;;  %v649_v42 = vld [vmem:[#allocation8 + $0x2f8] sm:$0xff] }
  0xd4   :  { %v357_v46 = vpop.f32.mrf.mxu0  ;;  %726 = vmatpush.msrb.mxu0 %v627_v43  ;;  %v638_v43 = vld [vmem:[#allocation8 + $0x2a0] sm:$0xff] }
  0xd5   :  { %v358_v48 = vadd.f32 %v357_v46, %v338_v44  ;;  %v628_v44 = vld [vmem:[#allocation8 + $0x250] sm:$0xff]  ;;  %v618_v46 = vld [vmem:[#allocation8 + $0x200] sm:$0xff]  ;;  %766 = vmatpush.msrb.mxu2 %v629_v45 }
  0xd6   :  { %v377_v49 = vpop.f32.mrf.mxu1  ;;  %746 = vmatpush.msrb.mxu1 %v628_v44  ;;  %707 = vmatpush.msra.mxu3 %v618_v46  ;;  %v639_v44 = vld [vmem:[#allocation8 + $0x2a8] sm:$0xff]  ;;  %v640_v45 = vld [vmem:[#allocation8 + $0x2b0] sm:$0xff]  ;;  %v641_v46 = vld [vmem:[#allocation8 + $0x2b8] sm:$0xff] }
  0xd7   :  { %v378_v51 = vadd.f32 %v377_v49, %v358_v48  ;;  %v620_v48 = vld [vmem:[#allocation8 + $0x210] sm:$0xff]  ;;  %v621_v49 = vld [vmem:[#allocation8 + $0x218] sm:$0xff]  ;;  %727 = vmatpush.msrb.mxu0 %v619_v47  ;;  %v630_v47 = vld [vmem:[#allocation8 + $0x260] sm:$0xff] }
  0xd8   :  { %v397_v52 = vpop.f32.mrf.mxu2  ;;  %747 = vmatpush.msrb.mxu1 %v620_v48  ;;  %767 = vmatpush.msrb.mxu2 %v621_v49  ;;  %v631_v48 = vld [vmem:[#allocation8 + $0x268] sm:$0xff]  ;;  %v632_v49 = vld [vmem:[#allocation8 + $0x270] sm:$0xff] }
  0xd9   :  { %v398_v53 = vadd.f32 %v397_v52, %v378_v51  ;;  %v611_v51 = vld [vmem:[#allocation8 + $0x1c8] sm:$0xff]  ;;  %v612_v52 = vld [vmem:[#allocation8 + $0x1d0] sm:$0xff]  ;;  %708 = vmatpush.msra.mxu3 %v610_v50  ;;  %v633_v50 = vld [vmem:[#allocation8 + $0x278] sm:$0xff] }
  0xda   :  { %v417_v54 = vpop.f32.mrf.mxu3  ;;  %728 = vmatpush.msrb.mxu0 %v611_v51  ;;  %748 = vmatpush.msrb.mxu1 %v612_v52  ;;  %v622_v51 = vld [vmem:[#allocation8 + $0x220] sm:$0xff]  ;;  %v623_v52 = vld [vmem:[#allocation8 + $0x228] sm:$0xff] }
  0xdb   :  { %v418_v55 = vadd.f32 %v417_v54, %v398_v53  ;;  %v613_v53 = vld [vmem:[#allocation8 + $0x1d8] sm:$0xff]  ;;  %v602_v54 = vld [vmem:[#allocation8 + $0x180] sm:$0xff] }
  0xdc   :  { %768 = vmatpush.msrb.mxu2 %v613_v53  ;;  %709 = vmatpush.msra.mxu3 %v602_v54  ;;  %v624_v53 = vld [vmem:[#allocation8 + $0x230] sm:$0xff]  ;;  %v625_v54 = vld [vmem:[#allocation8 + $0x238] sm:$0xff] }
  0xdd   :  { %vm420_vm0 = vcmp.gt.f32.partialorder %v418_v55, 0.0  ;;  %v421_v56 = vmul.f32 0.01, %v418_v55 }
  0xde   :  { %710 = vmatpush.msra.mxu3 %v594_v58  ;;  %v617_v58 = vld [vmem:[#allocation8 + $0x1f8] sm:$0xff] }
  0xdf   :  { %v422_v57 = vsel %vm420_vm0, %v418_v55, %v421_v56  ;;  %v603_v55 = vld [vmem:[#allocation8 + $0x188] sm:$0xff]  ;;  %v604_v56 = vld [vmem:[#allocation8 + $0x190] sm:$0xff] }
  0xe0   :  { %459 = vmatmul.f32.vlgmr.msra.gmra.mxu0 %v422_v57  ;;  %v605_v57 = vld [vmem:[#allocation8 + $0x198] sm:$0xff]  ;;  %749 = vmatpush.msrb.mxu1 %v604_v56  ;;  %v615_v56 = vld [vmem:[#allocation8 + $0x1e8] sm:$0xff] }
  0xe1   :  { %729 = vmatpush.msrb.mxu0 %v603_v55  ;;  %769 = vmatpush.msrb.mxu2 %v605_v57  ;;  %v614_v55 = vld [vmem:[#allocation8 + $0x1e0] sm:$0xff]  ;;  %v616_v57 = vld [vmem:[#allocation8 + $0x1f0] sm:$0xff] }
  0xe2   :  { %750 = vmatpush.msrb.mxu1 %v596_v60  ;;  %711 = vmatpush.msra.mxu3 %v586_v62  ;;  %v607_v60 = vld [vmem:[#allocation8 + $0x1a8] sm:$0xff]  ;;  %v609_v62 = vld [vmem:[#allocation8 + $0x1b8] sm:$0xff] }
  0xe3   :  { %730 = vmatpush.msrb.mxu0 %v595_v59  ;;  %770 = vmatpush.msrb.mxu2 %v597_v61  ;;  %v606_v59 = vld [vmem:[#allocation8 + $0x1a0] sm:$0xff]  ;;  %v608_v61 = vld [vmem:[#allocation8 + $0x1b0] sm:$0xff] }
  0xe4   :  { %751 = vmatpush.msrb.mxu1 %v588_v0  ;;  %712 = vmatpush.msra.mxu3 %v578_v2  ;;  %v599_v0 = vld [vmem:[#allocation8 + $0x168] sm:$0xff]  ;;  %v601_v2 = vld [vmem:[#allocation8 + $0x178] sm:$0xff] }
  0xe5   :  { %731 = vmatpush.msrb.mxu0 %v587_v63  ;;  %771 = vmatpush.msrb.mxu2 %v589_v1  ;;  %v598_v63 = vld [vmem:[#allocation8 + $0x160] sm:$0xff]  ;;  %v600_v1 = vld [vmem:[#allocation8 + $0x170] sm:$0xff] }
  0xe6   :  { %752 = vmatpush.msrb.mxu1 %v580_v5  ;;  %713 = vmatpush.msra.mxu3 %v570_v7  ;;  %v592_v5 = vld [vmem:[#allocation8 + $0x130] sm:$0xff]  ;;  %v582_v7 = vld [vmem:[#allocation8 + $0xe0] sm:$0xff] }
  0xe7   :  { %732 = vmatpush.msrb.mxu0 %v579_v3  ;;  %772 = vmatpush.msrb.mxu2 %v581_v6  ;;  %v590_v3 = vld [vmem:[#allocation8 + $0x120] sm:$0xff]  ;;  %v593_v6 = vld [vmem:[#allocation8 + $0x138] sm:$0xff] }
  0xe8   :  { %753 = vmatpush.msrb.mxu1 %v572_v9  ;;  %v584_v9 = vld [vmem:[#allocation8 + $0xf0] sm:$0xff] }
  0xe9   :  { %733 = vmatpush.msrb.mxu0 %v571_v8  ;;  %v583_v8 = vld [vmem:[#allocation8 + $0xe8] sm:$0xff] }
  0xea   :  { %754 = vmatpush.msrb.mxu1 %v564_v15  ;;  %v566_v15 = vld [vmem:[#allocation8 + $0x60] sm:$0xff] }
  0xec   :  { %755 = vmatpush.msrb.mxu1 %v556_v20  ;;  %v559_v20 = vld [vmem:[#allocation8 + $0x28] sm:$0xff] }
 0x15d   :  { %v460_v11 = vpop.f32.mrf.mxu0 }
 0x15e   :  { %v461_v12 = vadd.f32 %v903_v10, %v460_v11  ;;  %v573_v10 = vld [vmem:[#allocation8 + $0x98] sm:$0xff] }
 0x15f   :  { %773 = vmatpush.msrb.mxu2 %v573_v10  ;;  %v585_v10 = vld [vmem:[#allocation8 + $0xf8] sm:$0xff] }
 0x160   :  { %vm463_vm1 = vcmp.gt.f32.partialorder %v461_v12, 0.0  ;;  %v464_v13 = vmul.f32 0.01, %v461_v12 }
 0x161   :  { %774 = vmatpush.msrb.mxu2 %v565_v16  ;;  %v567_v16 = vld [vmem:[#allocation8 + $0x68] sm:$0xff] }
 0x162   :  { %v465_v14 = vsel %vm463_vm1, %v461_v12, %v464_v13  ;;  %v562_v12 = vld [vmem:[#allocation8 + $0x40] sm:$0xff]  ;;  %v563_v13 = vld [vmem:[#allocation8 + $0x48] sm:$0xff] }
 0x163   :  { %502 = vmatmul.f32.vlgmr.msra.gmra.mxu1 %v465_v14  ;;  %714 = vmatpush.msra.mxu3 %v562_v12  ;;  %v575_v12 = vld [vmem:[#allocation8 + $0xa8] sm:$0xff] }
 0x164   :  { %734 = vmatpush.msrb.mxu0 %v563_v13  ;;  %775 = vmatpush.msrb.mxu2 %v557_v21  ;;  %v576_v13 = vld [vmem:[#allocation8 + $0xb0] sm:$0xff] }
 0x165   :  { %715 = vmatpush.msra.mxu3 %v554_v17  ;;  %820 = vmatpush.msra.mxu1 %v680_v25  ;;  %v568_v17 = vld [vmem:[#allocation8 + $0x70] sm:$0xff] }
 0x166   :  { %735 = vmatpush.msrb.mxu0 %v555_v18  ;;  %v569_v18 = vld [vmem:[#allocation8 + $0x78] sm:$0xff]  ;;  %v560_v21 = vld [vmem:[#allocation8 + $0x30] sm:$0xff] }
 0x167   :  { %780 = vmatpush.msrb.mxu3 %v678_v22  ;;  %821 = vmatpush.msra.mxu1 %v672_v29  ;;  %v561_v22 = vld [vmem:[#allocation8 + $0x38] sm:$0xff] }
 0x168   :  { %800 = vmatpush.msra.mxu0 %v679_v24  ;;  %v682_v29 = vld [vmem:[%s1179_s10] sm:$0xff] }
 0x169   :  { %781 = vmatpush.msrb.mxu3 %v670_v27  ;;  %822 = vmatpush.msra.mxu1 %v664_v33  ;;  %v686_v33 = vperm.slane %v682_v29, 2 }
 0x16a   :  { %801 = vmatpush.msra.mxu0 %v671_v28 }
 0x16b   :  { %782 = vmatpush.msrb.mxu3 %v662_v31  ;;  %823 = vmatpush.msra.mxu1 %v656_v37 }
 0x16c   :  { %802 = vmatpush.msra.mxu0 %v663_v32  ;;  %v685_v32 = vperm.slane %v682_v29, 1 }
 0x16d   :  { %783 = vmatpush.msrb.mxu3 %v654_v35  ;;  %824 = vmatpush.msra.mxu1 %v648_v41  ;;  %v687_v35 = vperm.slane %v682_v29, 3 }
 0x16e   :  { %803 = vmatpush.msra.mxu0 %v655_v36 }
 0x16f   :  { %784 = vmatpush.msrb.mxu3 %v646_v39  ;;  %825 = vmatpush.msra.mxu1 %v640_v45 }
 0x170   :  { %804 = vmatpush.msra.mxu0 %v647_v40 }
 0x171   :  { %785 = vmatpush.msrb.mxu3 %v638_v43  ;;  %826 = vmatpush.msra.mxu1 %v632_v49  ;;  %v690_v43 = vperm.slane %v682_v29, 6 }
 0x172   :  { %805 = vmatpush.msra.mxu0 %v639_v44 }
 0x173   :  { %786 = vmatpush.msrb.mxu3 %v630_v47  ;;  %827 = vmatpush.msra.mxu1 %v624_v53 }
 0x174   :  { %806 = vmatpush.msra.mxu0 %v631_v48 }
 0x175   :  { %787 = vmatpush.msrb.mxu3 %v622_v51  ;;  %828 = vmatpush.msra.mxu1 %v616_v57  ;;  %v688_v51 = vperm.slane %v682_v29, 4 }
 0x176   :  { %807 = vmatpush.msra.mxu0 %v623_v52  ;;  %v691_v52 = vperm.slane %v682_v29, 7 }
 0x177   :  { %788 = vmatpush.msrb.mxu3 %v614_v55  ;;  %829 = vmatpush.msra.mxu1 %v608_v61 }
 0x178   :  { %808 = vmatpush.msra.mxu0 %v615_v56 }
 0x179   :  { %789 = vmatpush.msrb.mxu3 %v606_v59  ;;  %830 = vmatpush.msra.mxu1 %v600_v1 }
 0x17a   :  { %809 = vmatpush.msra.mxu0 %v607_v60 }
 0x17b   :  { %790 = vmatpush.msrb.mxu3 %v598_v63  ;;  %831 = vmatpush.msra.mxu1 %v592_v5 }
 0x17c   :  { %810 = vmatpush.msra.mxu0 %v599_v0 }
 0x17d   :  { %791 = vmatpush.msrb.mxu3 %v590_v3  ;;  %832 = vmatpush.msra.mxu1 %v584_v9 }
 0x17f   :  { %792 = vmatpush.msrb.mxu3 %v582_v7  ;;  %833 = vmatpush.msra.mxu1 %v576_v13 }
 0x181   :  { %834 = vmatpush.msra.mxu1 %v568_v17 }
 0x183   :  { %835 = vmatpush.msra.mxu1 %v560_v21 }
 0x1e0   :  { %v503_v11 = vpop.f32.mrf.mxu1 }
 0x1e1   :  { %v504_v14 = vadd.f32 %v904_v4, %v503_v11  ;;  %v591_v4 = vld [vmem:[#allocation8 + $0x128] sm:$0xff]  ;;  %v574_v11 = vld [vmem:[#allocation8 + $0xa0] sm:$0xff] }
 0x1e2   :  { %811 = vmatpush.msra.mxu0 %v591_v4  ;;  %793 = vmatpush.msrb.mxu3 %v574_v11 }
 0x1e3   :  { %vm506_vm2 = vcmp.gt.f32.partialorder %v504_v14, 0.0  ;;  %v507_v19 = vmul.f32 0.01, %v504_v14 }
 0x1e4   :  { %812 = vmatpush.msra.mxu0 %v583_v8  ;;  %794 = vmatpush.msrb.mxu3 %v566_v15 }
 0x1e5   :  { %v508_v23 = vsel %vm506_vm2, %v504_v14, %v507_v19  ;;  %v577_v14 = vld [vmem:[#allocation8 + $0xb8] sm:$0xff]  ;;  %v558_v19 = vld [vmem:[#allocation8 + $0x20] sm:$0xff] }
 0x1e6   :  { %545 = vmatmul.f32.vlgmr.msra.gmra.mxu2 %v508_v23  ;;  %813 = vmatpush.msra.mxu0 %v575_v12  ;;  %v905_v23 = vld [vmem:[%s1177_s8] ss:$0 sm:$0xff] }
 0x1e7   :  { %840 = vmatpush.msra.mxu2 %v681_v26  ;;  %795 = vmatpush.msrb.mxu3 %v558_v19 }
 0x1e8   :  { %814 = vmatpush.msra.mxu0 %v567_v16 }
 0x1e9   :  { %841 = vmatpush.msra.mxu2 %v673_v30 }
 0x1ea   :  { %815 = vmatpush.msra.mxu0 %v559_v20 }
 0x1eb   :  { %842 = vmatpush.msra.mxu2 %v665_v34  ;;  %v684_v34 = vperm.slane %v682_v29, 0 }
 0x1ed   :  { %843 = vmatpush.msra.mxu2 %v657_v38 }
 0x1ef   :  { %844 = vmatpush.msra.mxu2 %v649_v42  ;;  %v689_v42 = vperm.slane %v682_v29, 5 }
 0x1f1   :  { %845 = vmatpush.msra.mxu2 %v641_v46 }
 0x1f3   :  { %846 = vmatpush.msra.mxu2 %v633_v50 }
 0x1f5   :  { %847 = vmatpush.msra.mxu2 %v625_v54 }
 0x1f7   :  { %848 = vmatpush.msra.mxu2 %v617_v58 }
 0x1f9   :  { %849 = vmatpush.msra.mxu2 %v609_v62 }
 0x1fb   :  { %850 = vmatpush.msra.mxu2 %v601_v2 }
 0x1fd   :  { %851 = vmatpush.msra.mxu2 %v593_v6 }
 0x1ff   :  { %852 = vmatpush.msra.mxu2 %v585_v10 }
 0x201   :  { %853 = vmatpush.msra.mxu2 %v577_v14 }
 0x203   :  { %854 = vmatpush.msra.mxu2 %v569_v18 }
 0x205   :  { %855 = vmatpush.msra.mxu2 %v561_v22 }
 0x269   :  { %v546_v24 = vpop.f32.mrf.mxu2 }
 0x26a   :  { %v547_v25 = vadd.f32 %v905_v23, %v546_v24 }
 0x26c   :  { %vm549_vm3 = vcmp.gt.f32.partialorder %v547_v25, 0.0  ;;  %v550_v26 = vmul.f32 0.01, %v547_v25 }
 0x26e   :  { %v551_v27 = vsel %vm549_vm3, %v547_v25, %v550_v26 }
 0x26f   :  { %552 = vst [vmem:[#allocation2] sm:$0x3] %v551_v27 }
 0x276   :  { %v553_v28 = vld [vmem:[#allocation2] sm:$0x3] }
 0x277   :  { %716 = vmatmul.f32.vlgmr.msra.gmra.mxu3 %v553_v28  ;;  %736 = vmatmul.f32.vlgmr.msrb.gmra.mxu0 %v553_v28 }
 0x278   :  { %756 = vmatmul.f32.vlgmr.msrb.gmra.mxu1 %v553_v28  ;;  %776 = vmatmul.f32.vlgmr.msrb.gmra.mxu2 %v553_v28 }
 0x27f   :  { %796 = vmatmul.f32.vlgmr.msrb.gmra.mxu3 %v553_v28  ;;  %816 = vmatmul.f32.vlgmr.msra.gmra.mxu0 %v553_v28 }
 0x280   :  { %836 = vmatmul.f32.vlgmr.msra.gmra.mxu1 %v553_v28  ;;  %856 = vmatmul.f32.vlgmr.msra.gmra.mxu2 %v553_v28 }
 0x2f4   :  { %v737_v30 = vpop.f32.mrf.mxu0 }
 0x2f5   :  { %v757_v31 = vpop.f32.mrf.mxu1  ;;  %v738_v36 = vadd.f32 %v737_v30, %v685_v32 }
 0x2f6   :  { %v758_v37 = vadd.f32 %v757_v31, %v686_v33 }
 0x2f7   :  { %v868_v44 = vrot.slane %v738_v36, 6 }
 0x2f8   :  { %v869_v45 = vrot.slane %v758_v37, 4 }
 0x2fa   :  { %v717_v38 = vpop.f32.mrf.mxu3 }
 0x2fb   :  { %v777_v39 = vpop.f32.mrf.mxu2  ;;  %v718_v40 = vadd.f32 %v717_v38, %v684_v34 }
 0x2fc   :  { %v778_v41 = vadd.f32 %v777_v39, %v687_v35  ;;  %v817_v47 = vpop.f32.mrf.mxu0 }
 0x2fd   :  { %v837_v48 = vpop.f32.mrf.mxu1  ;;  %v875_v49 = vsel %vm874_vm4, %v718_v40, %v868_v44  ;;  %v818_v54 = vadd.f32 %v817_v47, %v689_v42 }
 0x2fe   :  { %v870_v46 = vrot.slane %v778_v41, 2  ;;  %v838_v55 = vadd.f32 %v837_v48, %v690_v43 }
 0x2ff   :  { %v871_v60 = vrot.slane %v818_v54, 6 }
 0x300   :  { %v877_v50 = vsel %vm876_vm5, %v869_v45, %v870_v46  ;;  %v872_v61 = vrot.slane %v838_v55, 4 }
 0x301   :  { %v879_v53 = vsel %vm878_vm6, %v875_v49, %v877_v50 }
 0x302   :  { %885 = vst [vmem:[%s1180_s11] sm:$0xff] %v879_v53  ;;  %v797_v56 = vpop.f32.mrf.mxu3 }
 0x303   :  { %v857_v57 = vpop.f32.mrf.mxu2  ;;  %v798_v58 = vadd.f32 %v797_v56, %v688_v51 }
 0x304   :  { %v858_v59 = vadd.f32 %v857_v57, %v691_v52 }
 0x305   :  { %v880_v63 = vsel %vm874_vm4, %v798_v58, %v871_v60 }
 0x306   :  { %v873_v62 = vrot.slane %v858_v59, 2 }
 0x308   :  { %v881_v0 = vsel %vm876_vm5, %v872_v61, %v873_v62 }
 0x309   :  { %v882_v1 = vsel %vm878_vm6, %v880_v63, %v881_v0 }
 0x30a   :  { %886 = vst [vmem:[%s1180_s11 + $0x8] sm:$0xff] %v882_v1 }
 0x30b   :  { %891 = vsyncpa [#allocation4], 1 }
 0x30c   :  { %892 = vsyncpa [#allocation6], 1 }
 0x30d   :  { %893 = vsyncpa [#allocation9], 1 }

</bundles_post_ra>
